<compile_context>
chip_gen: v7x
topology: tpu7x:2x2x1
jax: 0.10.0
libtpu: 0.0.40
codegen_flags: <defaults>
</compile_context>

<pallas_src>
import functools

import jax
import jax.numpy as jnp
from jax.experimental import pallas as pl
from jax.experimental.pallas import tpu as pltpu


def _round_up(x, m):
    return ((x + m - 1) // m) * m


def _mlp_softmax_kernel(x_ref, w1_ref, b1_ref, w2_ref, b2_ref, w3_ref, b3_ref,
                        o_ref):
    # --- Linear 1 + ReLU (f32 accumulation on the MXU) --------------------
    h1 = jnp.dot(x_ref[...], w1_ref[...], preferred_element_type=jnp.float32)
    h1 = jnp.maximum(h1 + b1_ref[...], 0.0)
    # --- Linear 2 + ReLU ---------------------------------------------------
    h2 = jnp.dot(h1.astype(w2_ref.dtype), w2_ref[...],
                 preferred_element_type=jnp.float32)
    h2 = jnp.maximum(h2 + b2_ref[...], 0.0)
    # --- Linear 3 (logits, lane-padded to 128) ------------------------------
    logits = jnp.dot(h2.astype(w3_ref.dtype), w3_ref[...],
                     preferred_element_type=jnp.float32)
    logits = logits + b3_ref[...]          # padded cols get -1e30 -> exp ~ 0
    # --- softmax over dim=1 (feature axis), exact normalization -------------
    m = jnp.max(logits, axis=-1, keepdims=True)
    e = jnp.exp(logits - m)
    denom = jnp.sum(e, axis=-1, keepdims=True)
    o_ref[...] = (e / denom).astype(o_ref.dtype)


@functools.partial(jax.jit, static_argnames=("block_b", "store_dtype"))
def nuisance_mlp_forward(x, params, *, block_b=2048, store_dtype=jnp.bfloat16):
    """x: (B, input_dim); params dict of f32 weights/biases. Returns (B, l) f32."""
    w1, b1, w2, b2, w3, b3 = (params["w1"], params["b1"], params["w2"],
                              params["b2"], params["w3"], params["b3"])
    B, D = x.shape
    H = w1.shape[1]          # 4 * l
    L = w3.shape[1]          # l

    # ---- lane-dense output: pad final projection to a multiple of 128 ------
    LP = _round_up(max(L, 128), 128)
    # Weights follow x.dtype (bf16 x -> native bf16 MXU); biases stay f32.
    w1c = w1.astype(x.dtype)
    w2c = w2.astype(x.dtype)
    w3p = jnp.pad(w3, ((0, 0), (0, LP - L))).astype(x.dtype)   # zero pad cols
    b1r = b1.astype(jnp.float32).reshape(1, H)
    b2r = b2.astype(jnp.float32).reshape(1, H)
    b3r = jnp.pad(b3.astype(jnp.float32), (0, LP - L),
                  constant_values=-1e30).reshape(1, LP)        # kill pad cols

    # ---- batch tile: big, sublane-aligned, no wrapper-side padding ---------
    TB = _round_up(min(block_b, B), 8)
    # Keep >= ~8 grid steps for large B so v7x's two TensorCores both get work
    # and the pipeline has depth (no-op for small B).
    if B // TB < 8 and B > 64:
        TB = _round_up(pl.cdiv(B, 8), 8)
    grid = (pl.cdiv(B, TB),)

    # ---- scoped-VMEM budget (only matters for very large TB on v5e) --------
    x_item = jnp.dtype(x.dtype).itemsize
    o_item = jnp.dtype(store_dtype).itemsize
    w_bytes = x_item * (D * H + H * H + H * LP) + 4 * (H + H + LP)
    est = 2 * TB * (D * x_item + LP * o_item) + 2 * w_bytes + (2 << 20)
    vmem_limit = int(est) if est > (14 << 20) else None

    batch_in_spec = pl.BlockSpec((TB, D), lambda i: (i, 0))
    batch_out_spec = pl.BlockSpec((TB, LP), lambda i: (i, 0))
    resident = lambda shape: pl.BlockSpec(shape, lambda i: (0, 0))

    out = pl.pallas_call(
        _mlp_softmax_kernel,
        out_shape=jax.ShapeDtypeStruct((B, LP), store_dtype),
        grid=grid,
        in_specs=[
            batch_in_spec,
            resident((D, H)), resident((1, H)),
            resident((H, H)), resident((1, H)),
            resident((H, LP)), resident((1, LP)),
        ],
        out_specs=batch_out_spec,
        compiler_params=pltpu.CompilerParams(
            dimension_semantics=("parallel",),   # megacore sharding on v7x
            vmem_limit_bytes=vmem_limit,
        ),
    )(x, w1c, b1r, w2c, b2r, w3p, b3r)

    # Slice padded lanes off and return f32 (module contract). Consumers that
    # can take the padded bf16 (B, 128) block directly should skip this.
    return out[:, :L].astype(jnp.float32)


def init_params(key, input_dim, l):
    """Deterministic init mimicking nn.Linear default (U[-1/sqrt(fan_in), ...])."""
    h = 4 * l
    ks = jax.random.split(key, 6)

    def lin(kw, kb, fan_in, fan_out):
        bound = 1.0 / jnp.sqrt(fan_in)
        w = jax.random.uniform(kw, (fan_in, fan_out), jnp.float32, -bound, bound)
        b = jax.random.uniform(kb, (fan_out,), jnp.float32, -bound, bound)
        return w, b

    w1, b1 = lin(ks[0], ks[1], input_dim, h)
    w2, b2 = lin(ks[2], ks[3], h, h)
    w3, b3 = lin(ks[4], ks[5], h, l)
    return {"w1": w1, "b1": b1, "w2": w2, "b2": b2, "w3": w3, "b3": b3}


def reference_forward(x, p):
    h1 = jnp.maximum(x @ p["w1"] + p["b1"], 0.0)
    h2 = jnp.maximum(h1 @ p["w2"] + p["b2"], 0.0)
    logits = h2 @ p["w3"] + p["b3"]
    return jax.nn.softmax(logits, axis=1)


if __name__ == "__main__":
    key = jax.random.PRNGKey(0)
    k_x, k_p = jax.random.split(key)

    batch, input_dim, l = 8, 32, 8      # hidden = 4*l = 32
    x = jax.random.normal(k_x, (batch, input_dim), jnp.float32)
    params = init_params(k_p, input_dim, l)

    ref = reference_forward(x, params)

    # Default path: bf16 store (halves output HBM traffic); math is f32.
    out = jax.block_until_ready(nuisance_mlp_forward(x, params))
    assert out.shape == (batch, l) and out.dtype == jnp.float32
    assert jnp.allclose(out, ref, atol=2e-2, rtol=2e-2)
    assert jnp.allclose(jnp.sum(out, axis=1), 1.0, atol=1e-2)

    # Full-precision store path: tighter check of the kernel math itself.
    out32 = jax.block_until_ready(
        nuisance_mlp_forward(x, params, store_dtype=jnp.float32))
    assert out32.shape == (batch, l)
    assert jnp.allclose(out32, ref, atol=1e-2, rtol=1e-2)
    assert jnp.allclose(jnp.sum(out32, axis=1), 1.0, atol=1e-3)

    print("KERNEL_OK")
</pallas_src>

<mosaic_0001>
module attributes {stable_mosaic.version = 11 : i64} {
  func.func @_mlp_softmax_kernel(%arg0: i32, %arg1: memref<8x32xf32, #tpu.memory_space<vmem>>, %arg2: memref<32x32xf32, #tpu.memory_space<vmem>>, %arg3: memref<1x32xf32, #tpu.memory_space<vmem>>, %arg4: memref<32x32xf32, #tpu.memory_space<vmem>>, %arg5: memref<1x32xf32, #tpu.memory_space<vmem>>, %arg6: memref<32x128xf32, #tpu.memory_space<vmem>>, %arg7: memref<1x128xf32, #tpu.memory_space<vmem>>, %arg8: memref<8x128xbf16, #tpu.memory_space<vmem>>) attributes {dimension_semantics = [#tpu.dimension_semantics<parallel>], iteration_bounds = array<i64: 1>, scalar_prefetch = 0 : i64, scratch_operands = 0 : i64, tpu.core_type = #tpu.core_type<tc>, window_params = [{transform_indices = @transform_0, window_bounds = array<i64: 8, 32>}, {pipeline_mode = #tpu.pipeline_mode<synchronous>, transform_indices = @transform_1, window_bounds = array<i64: 32, 32>}, {pipeline_mode = #tpu.pipeline_mode<synchronous>, transform_indices = @transform_2, window_bounds = array<i64: 1, 32>}, {pipeline_mode = #tpu.pipeline_mode<synchronous>, transform_indices = @transform_3, window_bounds = array<i64: 32, 32>}, {pipeline_mode = #tpu.pipeline_mode<synchronous>, transform_indices = @transform_4, window_bounds = array<i64: 1, 32>}, {pipeline_mode = #tpu.pipeline_mode<synchronous>, transform_indices = @transform_5, window_bounds = array<i64: 32, 128>}, {pipeline_mode = #tpu.pipeline_mode<synchronous>, transform_indices = @transform_6, window_bounds = array<i64: 1, 128>}, {transform_indices = @transform_7, window_bounds = array<i64: 8, 128>}]} {
    %c0 = arith.constant 0 : index
    %c0_0 = arith.constant 0 : index
    %0 = vector.load %arg1[%c0, %c0_0] : memref<8x32xf32, #tpu.memory_space<vmem>>, vector<8x32xf32>
    %c0_1 = arith.constant 0 : index
    %c0_2 = arith.constant 0 : index
    %1 = vector.load %arg2[%c0_1, %c0_2] : memref<32x32xf32, #tpu.memory_space<vmem>>, vector<32x32xf32>
    %cst = arith.constant dense<0.000000e+00> : vector<8x32xf32>
    %2 = tpu.matmul %0, %1, %cst {dimension_numbers = #tpu.dot_dimension_numbers<[1], [0], [0], [1], [0, 0, 1, 1], [], []>} : vector<8x32xf32>, vector<32x32xf32>, vector<8x32xf32> -> vector<8x32xf32>
    %c0_3 = arith.constant 0 : index
    %c0_4 = arith.constant 0 : index
    %3 = vector.load %arg3[%c0_3, %c0_4] : memref<1x32xf32, #tpu.memory_space<vmem>>, vector<1x32xf32>
    %4 = vector.broadcast %3 : vector<1x32xf32> to vector<8x32xf32>
    %5 = arith.addf %2, %4 : vector<8x32xf32>
    %cst_5 = arith.constant 0.000000e+00 : f32
    %6 = vector.broadcast %cst_5 : f32 to vector<8x32xf32>
    %7 = arith.maximumf %5, %6 : vector<8x32xf32>
    %c0_6 = arith.constant 0 : index
    %c0_7 = arith.constant 0 : index
    %8 = vector.load %arg4[%c0_6, %c0_7] : memref<32x32xf32, #tpu.memory_space<vmem>>, vector<32x32xf32>
    %cst_8 = arith.constant dense<0.000000e+00> : vector<8x32xf32>
    %9 = tpu.matmul %7, %8, %cst_8 {dimension_numbers = #tpu.dot_dimension_numbers<[1], [0], [0], [1], [0, 0, 1, 1], [], []>} : vector<8x32xf32>, vector<32x32xf32>, vector<8x32xf32> -> vector<8x32xf32>
    %c0_9 = arith.constant 0 : index
    %c0_10 = arith.constant 0 : index
    %10 = vector.load %arg5[%c0_9, %c0_10] : memref<1x32xf32, #tpu.memory_space<vmem>>, vector<1x32xf32>
    %11 = vector.broadcast %10 : vector<1x32xf32> to vector<8x32xf32>
    %12 = arith.addf %9, %11 : vector<8x32xf32>
    %cst_11 = arith.constant 0.000000e+00 : f32
    %13 = vector.broadcast %cst_11 : f32 to vector<8x32xf32>
    %14 = arith.maximumf %12, %13 : vector<8x32xf32>
    %c0_12 = arith.constant 0 : index
    %c0_13 = arith.constant 0 : index
    %15 = vector.load %arg6[%c0_12, %c0_13] : memref<32x128xf32, #tpu.memory_space<vmem>>, vector<32x128xf32>
    %cst_14 = arith.constant dense<0.000000e+00> : vector<8x128xf32>
    %16 = tpu.matmul %14, %15, %cst_14 {dimension_numbers = #tpu.dot_dimension_numbers<[1], [0], [0], [1], [0, 0, 1, 1], [], []>} : vector<8x32xf32>, vector<32x128xf32>, vector<8x128xf32> -> vector<8x128xf32>
    %c0_15 = arith.constant 0 : index
    %c0_16 = arith.constant 0 : index
    %17 = vector.load %arg7[%c0_15, %c0_16] : memref<1x128xf32, #tpu.memory_space<vmem>>, vector<1x128xf32>
    %18 = vector.broadcast %17 : vector<1x128xf32> to vector<8x128xf32>
    %19 = arith.addf %16, %18 : vector<8x128xf32>
    %cst_17 = arith.constant dense<0xFF800000> : vector<8xf32>
    %20 = vector.multi_reduction <maximumf>, %19, %cst_17 [1] : vector<8x128xf32> to vector<8xf32>
    %21 = vector.shape_cast %20 : vector<8xf32> to vector<8x1xf32>
    %22 = vector.broadcast %21 : vector<8x1xf32> to vector<8x128xf32>
    %23 = arith.subf %19, %22 : vector<8x128xf32>
    %24 = math.exp %23 : vector<8x128xf32>
    %cst_18 = arith.constant dense<0.000000e+00> : vector<8xf32>
    %25 = vector.multi_reduction <add>, %24, %cst_18 [1] : vector<8x128xf32> to vector<8xf32>
    %26 = vector.shape_cast %25 : vector<8xf32> to vector<8x1xf32>
    %27 = vector.broadcast %26 : vector<8x1xf32> to vector<8x128xf32>
    %28 = arith.divf %24, %27 : vector<8x128xf32>
    %29 = arith.truncf %28 : vector<8x128xf32> to vector<8x128xbf16>
    %c0_19 = arith.constant 0 : index
    %c0_20 = arith.constant 0 : index
    %30 = vector.load %arg8[%c0_19, %c0_20] : memref<8x128xbf16, #tpu.memory_space<vmem>>, vector<8x128xbf16>
    tpu.vector_store %arg8[%c0_19, %c0_20], %29 {strides = array<i32>} : memref<8x128xbf16, #tpu.memory_space<vmem>>, vector<8x128xbf16>,
    return
  }
  func.func @transform_0(%arg0: i32) -> (i32, i32) {
    %c0_i32 = arith.constant 0 : i32
    %c0_i32_0 = arith.constant 0 : i32
    return %arg0, %c0_i32 : i32, i32
  }
  func.func @transform_1(%arg0: i32) -> (i32, i32) {
    %c0_i32 = arith.constant 0 : i32
    %c0_i32_0 = arith.constant 0 : i32
    %c0_i32_1 = arith.constant 0 : i32
    return %c0_i32, %c0_i32_0 : i32, i32
  }
  func.func @transform_2(%arg0: i32) -> (i32, i32) {
    %c0_i32 = arith.constant 0 : i32
    %c0_i32_0 = arith.constant 0 : i32
    %c0_i32_1 = arith.constant 0 : i32
    return %c0_i32, %c0_i32_0 : i32, i32
  }
  func.func @transform_3(%arg0: i32) -> (i32, i32) {
    %c0_i32 = arith.constant 0 : i32
    %c0_i32_0 = arith.constant 0 : i32
    %c0_i32_1 = arith.constant 0 : i32
    return %c0_i32, %c0_i32_0 : i32, i32
  }
  func.func @transform_4(%arg0: i32) -> (i32, i32) {
    %c0_i32 = arith.constant 0 : i32
    %c0_i32_0 = arith.constant 0 : i32
    %c0_i32_1 = arith.constant 0 : i32
    return %c0_i32, %c0_i32_0 : i32, i32
  }
  func.func @transform_5(%arg0: i32) -> (i32, i32) {
    %c0_i32 = arith.constant 0 : i32
    %c0_i32_0 = arith.constant 0 : i32
    %c0_i32_1 = arith.constant 0 : i32
    return %c0_i32, %c0_i32_0 : i32, i32
  }
  func.func @transform_6(%arg0: i32) -> (i32, i32) {
    %c0_i32 = arith.constant 0 : i32
    %c0_i32_0 = arith.constant 0 : i32
    %c0_i32_1 = arith.constant 0 : i32
    return %c0_i32, %c0_i32_0 : i32, i32
  }
  func.func @transform_7(%arg0: i32) -> (i32, i32) {
    %c0_i32 = arith.constant 0 : i32
    %c0_i32_0 = arith.constant 0 : i32
    return %arg0, %c0_i32 : i32, i32
  }
}

</mosaic_0001>

<bundles_post_ra>
// kernel: nuisance_mlp_forward.1
= control target key start
LH: loop header
LB: loop body
LE: loop exit
PB: predicated region body
PF: predicated region fallthrough
CT: control target
= control target key end

     0   :  { %v376_v0 = vmov 0.0|0.0   ;;  %vm377_vm0 = vmmov 0   ;;  %v378_v4 = vmov 0.0   ;;  %vm38_vm1 = vcmask 261120   ;;  %s476_s1 = inlined_call_operand.vmem [shape: f32[32,32], index: 1, kind: input, shape index: {}]   ;;  %s477_s3 = inlined_call_operand.vmem [shape: f32[32,32], index: 3, kind: input, shape index: {}]   ;;  %s478_s0 = inlined_call_operand.vmem [shape: f32[8,32], index: 0, kind: input, shape index: {}]   ;;  %s479_s5 = inlined_call_operand.vmem [shape: f32[32,128], index: 5, kind: input, shape index: {}]   ;;  %s480_s2 = inlined_call_operand.vmem [shape: f32[1,32], index: 2, kind: input, shape index: {}]   ;;  %s481_s4 = inlined_call_operand.vmem [shape: f32[1,32], index: 4, kind: input, shape index: {}]   ;;  %s482_s6 = inlined_call_operand.vmem [shape: f32[1,128], index: 6, kind: input, shape index: {}]   ;;  %s483_s7 = inlined_call_operand.vmem [shape: bf16[8,128], index: 7, kind: output, shape index: {}]  }
   0x1   :  { %351 = vmatprep.subr.bf16.mxu0 %v376_v0  ;;  %v27_v1 = vld [vmem:[%s476_s1] sm:$0xff]  ;;  %v28_v2 = vld [vmem:[%s476_s1 + $0x8] sm:$0xff]  ;;  %v29_v3 = vld [vmem:[%s476_s1 + $0x10] sm:$0xff]  ;;  %326 = vmatprep.mubr.msk.f32.mxu0 %vm377_vm0, %v378_v4 }
   0x2   :  { %v352_v5 = vpack.c.bf16 %v28_v2, %v27_v1  ;;  %v30_v6 = vld [vmem:[%s476_s1 + $0x18] sm:$0xff]  ;;  %357 = vmatprep.subr.bf16.mxu1 %v376_v0  ;;  %v113_v7 = vld [vmem:[%s477_s3] sm:$0xff]  ;;  %337 = vmatprep.mubr.msk.f32.mxu1 %vm377_vm0, %v378_v4  ;;  %v114_v8 = vld [vmem:[%s477_s3 + $0x8] sm:$0xff] }
   0x3   :  { %v355_v9 = vpack.c.bf16 %v30_v6, %v29_v3  ;;  %v358_v10 = vpack.c.bf16 %v114_v8, %v113_v7  ;;  %v26_v11 = vld [vmem:[%s478_s0] sm:$0xff]  ;;  %v115_v12 = vld [vmem:[%s477_s3 + $0x10] sm:$0xff]  ;;  %v116_v13 = vld [vmem:[%s477_s3 + $0x18] sm:$0xff] }
   0x4   :  { %353 = vmatpush3.bf16.msra.mxu0 %v352_v5  ;;  %v361_v14 = vpack.c.bf16 %v116_v13, %v115_v12  ;;  %v198_v15 = vld [vmem:[%s479_s5] sm:$0xff]  ;;  %v199_v16 = vld [vmem:[%s479_s5 + $0x8] sm:$0xff]  ;;  %v200_v23 = vld [vmem:[%s479_s5 + $0x10] sm:$0xff] }
   0x5   :  { %354 = vmatprep.subr.bf16.mxu0 %v376_v0  ;;  %359 = vmatpush3.bf16.msra.mxu1 %v358_v10  ;;  %v364_v17 = vpack.c.bf16 %v199_v16, %v198_v15  ;;  %v297_v18 = vld [vmem:[%s480_s2] ss:$0 sm:$0xff]  ;;  %v201_v24 = vld [vmem:[%s479_s5 + $0x18] sm:$0xff] }
   0x6   :  { %360 = vmatprep.subr.bf16.mxu1 %v376_v0  ;;  %v367_v25 = vpack.c.bf16 %v201_v24, %v200_v23  ;;  %v299_v26 = vld [vmem:[%s481_s4] ss:$0 sm:$0xff] }
   0x7   :  { %v301_v31 = vld [vmem:[%s482_s6] ss:$0 sm:$0xff] }
   0x8   :  { %356 = vmatpush3.bf16.msra.mxu0 %v355_v9 }
   0x9   :  { %363 = vmatprep.subr.bf16.mxu0 %v376_v0  ;;  %362 = vmatpush3.bf16.msra.mxu1 %v361_v14 }
   0xb   :  { %327 = vmatmul.mubr.msk.f32.vlgmr.msra.gmra.mrb[0].mxu0 %vm38_vm1, %v26_v11 }
   0xc   :  { %348 = vmatprep.mubr.msk.f32.mxu0 %vm377_vm0, %v378_v4  ;;  %365 = vmatpush3.bf16.msra.mxu0 %v364_v17 }
   0xd   :  { %366 = vmatprep.subr.bf16.mxu0 %v376_v0 }
  0x10   :  { %368 = vmatpush3.bf16.msra.mxu0 %v367_v25 }
  0xde   :  { %v108_v19 = vpop.f32.mrb[0].mxu0 }
  0xdf   :  { %v109_v20 = vadd.f32 %v297_v18, %v108_v19  ;;  %v328_v21 = vpop.f32.mrb[1].mxu0 }
  0xe1   :  { %v112_v22 = vmax.f32 %v109_v20, 0.0 }
  0xe3   :  { %338 = vmatmul.mubr.msk.f32.vlgmr.msra.gmra.mrb[0].mxu1 %vm38_vm1, %v112_v22 }
 0x1b6   :  { %v193_v27 = vpop.f32.mrb[0].mxu1 }
 0x1b7   :  { %v194_v28 = vadd.f32 %v299_v26, %v193_v27  ;;  %v339_v29 = vpop.f32.mrb[1].mxu1 }
 0x1b9   :  { %v197_v30 = vmax.f32 %v194_v28, 0.0 }
 0x1bb   :  { %349 = vmatmul.mubr.msk.f32.vlgmr.msra.gmra.mrb[2].mxu0 %vm38_vm1, %v197_v30 }
 0x28e   :  { %v278_v32 = vpop.f32.mrb[2].mxu0 }
 0x28f   :  { %v279_v33 = vadd.f32 %v301_v31, %v278_v32  ;;  %v350_v34 = vpop.f32.mrb[3].mxu0 }
 0x291   :  { %282 = vmax.xlane.f32.xlu0 %v279_v33 }
 0x31e   :  { %v283_v35 = vpop.xlane.xlu0 %282 }
 0x31f   :  { %v284_v36 = vsub.f32 %v279_v33, %v283_v35 }
 0x321   :  { %v285_v37 = vmul.f32 1.442695, %v284_v36 }
 0x323   :  { %372 = vpow2.f32 %v285_v37 }
 0x32d   :  { %v373_v38 = vpop.eup %372 }
 0x32e   :  { %287 = vadd.xlane.f32.xlu0 %v373_v38 }
 0x3bb   :  { %v288_v39 = vpop.xlane.xlu0 %287 }
 0x3bc   :  { %374 = vrcp.f32 %v288_v39 }
 0x3c6   :  { %v375_v40 = vpop.eup %374 }
 0x3c7   :  { %v290_v41 = vmul.f32 %v375_v40, %v373_v38 }
 0x3c9   :  { %v291_v42 = vpack.c.bf16 %v290_v41, %v290_v41 }
 0x3cb   :  { %292 = vst [vmem:[%s483_s7] sm:$0xf] %v291_v42 }

</bundles_post_ra>
